<compile_context>
chip_gen: v6e
topology: v6e:2x2x1
jax: 0.10.0
libtpu: 0.0.40
codegen_flags: <defaults>
</compile_context>

<pallas_src>
import jax
import jax.numpy as jnp
from jax.experimental import pallas as pl
from jax.experimental.pallas import tpu as pltpu


# --------------------------------------------------------------------------- #
# Kernel
# --------------------------------------------------------------------------- #
def _quant_kernel(x_ref, scale_ref, thr_ref, o_ref):
    # Compare in f32 regardless of input dtype (matches f32 PyTorch math near
    # the decision boundary).  (tile_b, tile_d) * (1, tile_d) - (1, tile_d)
    # broadcasts over the batch tile; VPU only, memory-bound.
    x = x_ref[...].astype(jnp.float32)
    y = x * scale_ref[...] - thr_ref[...]
    o_ref[...] = (y > 0.0).astype(o_ref.dtype)


# --------------------------------------------------------------------------- #
# Tiling heuristics
# --------------------------------------------------------------------------- #
_SUBLANE_BY_ITEMSIZE = {4: 8, 2: 16, 1: 32}


def _sublane_rows(dtype):
    return _SUBLANE_BY_ITEMSIZE.get(jnp.dtype(dtype).itemsize, 8)


def _choose_tiles(B, D, x_dtype, out_dtype, target_bytes=3 << 20):
    """Pick (tile_b, tile_d).

    target_bytes bounds x-tile + out-tile bytes (~3 MiB keeps the
    double-buffered working set ~<= 12 MiB: safe under v5e's 16 MiB scoped VMEM
    default and far under v6e/v7x's 32 MiB, while sitting past the measured
    HBM-roofline knee).
    """
    x_it = jnp.dtype(x_dtype).itemsize
    o_it = jnp.dtype(out_dtype).itemsize
    per_elem = x_it + o_it
    sub = max(_sublane_rows(x_dtype), _sublane_rows(out_dtype))
    total_bytes = B * D * per_elem

    # --- lane (D) tiling: only when even a minimal-height tile blows the budget
    if D > 128 and sub * D * per_elem > target_bytes:
        tile_d = (target_bytes // (sub * per_elem) // 128) * 128
        tile_d = int(min(max(128, tile_d), D))
    else:
        tile_d = D

    # --- sublane (B) tiling
    row_bytes = tile_d * per_elem
    rows = max(1, target_bytes // row_bytes)
    if total_bytes > (1 << 20):
        # Non-trivial input: make sure the parallel grid has >= ~4 blocks so
        # both v7x TensorCores get work and the DMA pipeline can overlap.
        rows = min(rows, max(sub, pl.cdiv(B, 4)))
    else:
        # Tiny input: a single full block is cheapest (one grid step).
        if rows >= B and tile_d == D:
            return B, D

    if rows >= B:
        tile_b = B                       # full batch dim (exempt from 8-row rule)
    else:
        tile_b = max(sub, (rows // sub) * sub)
        tile_b = int(min(tile_b, B))
    return tile_b, tile_d


# --------------------------------------------------------------------------- #
# Wrapper
# --------------------------------------------------------------------------- #
def quantization_layer(x, scale, thresholds, *, temperature=5.0, training=True,
                       out_dtype=jnp.bfloat16, tile_b=None, tile_d=None,
                       min_pallas_elems=512 * 1024):
    """x: (B, D) float. scale/thresholds: (D,). Returns (B, D) of exact 0/1.

    `temperature` / `training` are kept for API parity with the PyTorch module;
    the forward value is identical for both modes (see header comment).
    `out_dtype` defaults to bfloat16 (0/1 exactly representable, 2/3 of the
    output HBM traffic of float32); pass jnp.float32 for dtype parity.
    `min_pallas_elems`: below this element count, skip pallas_call and use the
    plain jnp expression (kernel-launch overhead dwarfs the work for tiny x).
    """
    if temperature <= 0:
        raise ValueError("temperature must be > 0 (sign-test reduction assumes it)")
    del training  # forward value does not depend on it

    B, D = x.shape
    scale2 = scale.reshape(1, D).astype(jnp.float32)
    thr2 = thresholds.reshape(1, D).astype(jnp.float32)

    if x.size < min_pallas_elems:
        y = x.astype(jnp.float32) * scale2 - thr2
        return (y > 0.0).astype(out_dtype)

    auto_b, auto_d = _choose_tiles(B, D, x.dtype, out_dtype)
    tile_b = int(min(tile_b if tile_b is not None else auto_b, B))
    tile_d = int(min(tile_d if tile_d is not None else auto_d, D))

    grid = (pl.cdiv(B, tile_b), pl.cdiv(D, tile_d))
    bytes_accessed = (x.size * jnp.dtype(x.dtype).itemsize
                      + (scale2.size + thr2.size) * 4
                      + B * D * jnp.dtype(out_dtype).itemsize)

    return pl.pallas_call(
        _quant_kernel,
        out_shape=jax.ShapeDtypeStruct((B, D), out_dtype),
        grid_spec=pltpu.PrefetchScalarGridSpec(
            num_scalar_prefetch=0,
            grid=grid,
            in_specs=[
                pl.BlockSpec((tile_b, tile_d), lambda i, j: (i, j)),   # x tile
                pl.BlockSpec((1, tile_d), lambda i, j: (0, j)),        # scale
                pl.BlockSpec((1, tile_d), lambda i, j: (0, j)),        # thresholds
            ],
            out_specs=pl.BlockSpec((tile_b, tile_d), lambda i, j: (i, j)),
        ),
        compiler_params=pltpu.CompilerParams(
            dimension_semantics=("parallel", "parallel"),
            vmem_limit_bytes=32 * 1024 * 1024,   # fits v5e/v6e/v7x physical VMEM
        ),
        cost_estimate=pl.CostEstimate(
            flops=2 * B * D, transcendentals=0, bytes_accessed=bytes_accessed),
    )(x, scale2, thr2)


# --------------------------------------------------------------------------- #
# Reference & tests
# --------------------------------------------------------------------------- #
def _reference(x, scale, thresholds, temperature, training):
    """Faithful jnp transcription of the PyTorch forward (value semantics)."""
    y = x.astype(jnp.float32) * scale[None, :] - thresholds[None, :]
    if training:
        s = jax.nn.sigmoid(y / temperature)
        return (s > 0.5).astype(jnp.float32)
    return (y > 0.0).astype(jnp.float32)


if __name__ == "__main__":
    key = jax.random.PRNGKey(0)

    # --- Test 1: small embedding-sized input, default bf16 output -----------
    B, D = 8, 128
    x = jax.random.normal(key, (B, D), dtype=jnp.float32)
    scale = jnp.ones((D,), dtype=jnp.float32)        # nn.Parameter(torch.ones(dim))
    thresholds = jnp.zeros((D,), dtype=jnp.float32)  # nn.Parameter(torch.zeros(dim))

    out_train = quantization_layer(x, scale, thresholds, temperature=5.0,
                                   training=True, min_pallas_elems=0)
    out_eval = quantization_layer(x, scale, thresholds, temperature=5.0,
                                  training=False, min_pallas_elems=0)
    jax.block_until_ready(out_train)
    jax.block_until_ready(out_eval)
    assert out_train.dtype == jnp.bfloat16
    assert jnp.array_equal(out_train.astype(jnp.float32),
                           _reference(x, scale, thresholds, 5.0, True)), \
        "training-mode mismatch"
    assert jnp.array_equal(out_eval.astype(jnp.float32),
                           _reference(x, scale, thresholds, 5.0, False)), \
        "eval-mode mismatch"

    # --- Test 2: non-divisible batch + explicit 2-D tiling, f32 output ------
    B2, D2 = 24, 256
    x2 = jax.random.normal(jax.random.fold_in(key, 1), (B2, D2), dtype=jnp.float32)
    scale_r = jax.random.normal(jax.random.fold_in(key, 2), (D2,), dtype=jnp.float32)
    thr_r = 0.1 * jax.random.normal(jax.random.fold_in(key, 3), (D2,), dtype=jnp.float32)

    out2 = quantization_layer(x2, scale_r, thr_r, temperature=5.0, training=True,
                              out_dtype=jnp.float32, tile_b=16, tile_d=128,
                              min_pallas_elems=0)
    jax.block_until_ready(out2)
    assert jnp.array_equal(out2, _reference(x2, scale_r, thr_r, 5.0, True)), \
        "tail-block / D-tiling mismatch"

    # --- Test 3: auto-tiled multi-block grid (exercises _choose_tiles) ------
    B3, D3 = 1024, 256
    x3 = jax.random.normal(jax.random.fold_in(key, 4), (B3, D3), dtype=jnp.bfloat16)
    scale3 = 1.0 + 0.1 * jax.random.normal(jax.random.fold_in(key, 5), (D3,),
                                           dtype=jnp.float32)
    thr3 = 0.05 * jax.random.normal(jax.random.fold_in(key, 6), (D3,),
                                    dtype=jnp.float32)
    out3 = quantization_layer(x3, scale3, thr3, temperature=0.5, training=False,
                              min_pallas_elems=0)
    jax.block_until_ready(out3)
    assert jnp.array_equal(out3.astype(jnp.float32),
                           _reference(x3, scale3, thr3, 0.5, False)), \
        "auto-tiling / bf16-input mismatch"

    print("KERNEL_OK")
</pallas_src>

<mosaic_0001>
module attributes {stable_mosaic.version = 11 : i64} {
  func.func @_quant_kernel(%arg0: i32, %arg1: i32, %arg2: memref<8x128xf32, #tpu.memory_space<vmem>>, %arg3: memref<1x128xf32, #tpu.memory_space<vmem>>, %arg4: memref<1x128xf32, #tpu.memory_space<vmem>>, %arg5: memref<8x128xbf16, #tpu.memory_space<vmem>>) attributes {dimension_semantics = [#tpu.dimension_semantics<parallel>, #tpu.dimension_semantics<parallel>], iteration_bounds = array<i64: 1, 1>, scalar_prefetch = 0 : i64, scratch_operands = 0 : i64, tpu.core_type = #tpu.core_type<tc>, window_params = [{transform_indices = @transform_0, window_bounds = array<i64: 8, 128>}, {transform_indices = @transform_1, window_bounds = array<i64: 1, 128>}, {transform_indices = @transform_2, window_bounds = array<i64: 1, 128>}, {transform_indices = @transform_3, window_bounds = array<i64: 8, 128>}]} {
    %c0 = arith.constant 0 : index
    %c0_0 = arith.constant 0 : index
    %0 = vector.load %arg2[%c0, %c0_0] : memref<8x128xf32, #tpu.memory_space<vmem>>, vector<8x128xf32>
    %c0_1 = arith.constant 0 : index
    %c0_2 = arith.constant 0 : index
    %1 = vector.load %arg3[%c0_1, %c0_2] : memref<1x128xf32, #tpu.memory_space<vmem>>, vector<1x128xf32>
    %2 = vector.broadcast %1 : vector<1x128xf32> to vector<8x128xf32>
    %3 = arith.mulf %0, %2 : vector<8x128xf32>
    %c0_3 = arith.constant 0 : index
    %c0_4 = arith.constant 0 : index
    %4 = vector.load %arg4[%c0_3, %c0_4] : memref<1x128xf32, #tpu.memory_space<vmem>>, vector<1x128xf32>
    %5 = vector.broadcast %4 : vector<1x128xf32> to vector<8x128xf32>
    %6 = arith.subf %3, %5 : vector<8x128xf32>
    %cst = arith.constant 0.000000e+00 : f32
    %7 = vector.broadcast %cst : f32 to vector<8x128xf32>
    %8 = arith.cmpf ogt, %6, %7 : vector<8x128xf32>
    %9 = arith.extui %8 : vector<8x128xi1> to vector<8x128xi32>
    %10 = arith.sitofp %9 : vector<8x128xi32> to vector<8x128xf32>
    %11 = arith.truncf %10 : vector<8x128xf32> to vector<8x128xbf16>
    %c0_5 = arith.constant 0 : index
    %c0_6 = arith.constant 0 : index
    %12 = vector.load %arg5[%c0_5, %c0_6] : memref<8x128xbf16, #tpu.memory_space<vmem>>, vector<8x128xbf16>
    tpu.vector_store %arg5[%c0_5, %c0_6], %11 {strides = array<i32>} : memref<8x128xbf16, #tpu.memory_space<vmem>>, vector<8x128xbf16>,
    return
  }
  func.func @transform_0(%arg0: i32, %arg1: i32) -> (i32, i32) {
    %c0_i32 = arith.constant 0 : i32
    return %arg0, %arg1 : i32, i32
  }
  func.func @transform_1(%arg0: i32, %arg1: i32) -> (i32, i32) {
    %c0_i32 = arith.constant 0 : i32
    %c0_i32_0 = arith.constant 0 : i32
    return %c0_i32, %arg1 : i32, i32
  }
  func.func @transform_2(%arg0: i32, %arg1: i32) -> (i32, i32) {
    %c0_i32 = arith.constant 0 : i32
    %c0_i32_0 = arith.constant 0 : i32
    return %c0_i32, %arg1 : i32, i32
  }
  func.func @transform_3(%arg0: i32, %arg1: i32) -> (i32, i32) {
    %c0_i32 = arith.constant 0 : i32
    return %arg0, %arg1 : i32, i32
  }
}

</mosaic_0001>

<bundles_post_ra>
// kernel: tpu_custom_call.1
= control target key start
LH: loop header
LB: loop body
LE: loop exit
PB: predicated region body
PF: predicated region fallthrough
CT: control target
= control target key end

     0   :  { %8 = vsyncpa [#allocation3], 0  ;;  %s149_s0 = inlined_call_operand.hbm [shape: f32[8,128], index: 0, kind: input, shape index: {}]   ;;  %s150_s1 = inlined_call_operand.vmem [shape: f32[1,128], index: 1, kind: input, shape index: {}]   ;;  %s151_s2 = inlined_call_operand.vmem [shape: f32[1,128], index: 2, kind: input, shape index: {}]   ;;  %s152_s3 = inlined_call_operand.hbm [shape: bf16[8,128], index: 3, kind: output, shape index: {}]  }
   0x1   :  { %9 = vsyncpa [#allocation4], 0  ;;  %s114_s12 = smov [#allocation2]  }
   0x2   :  { %s16_s13 = sshll.u32 %s114_s12, 4  ;;  %s17_s13 = int_to_ptr.vmem [resolvable:$true] %s16_s13 }
   0x3   :  { %s78_s14 = scalar_lea.vmem %s17_s13, 128  ;;  %p83_p1 = scmp.lt.s32.totalorder %s17_s13, %s17_s13 }
   0x4   :  { %p79_p0 = scmp.ne.s32.totalorder %s17_s13, %s78_s14  ;;  %p84_p2 = scmp.lt.s32.totalorder %s78_s14, %s78_s14 }
   0x6   :  { %p85_p3 = por %p84_p2, %p83_p1 }
   0x8   :  { %p86_p4 = pnand %p85_p3, %p79_p0 }
   0xa   :  { %89 = shalt.err (!%p86_p4)
}
   0xb   :  { %19 = dma.hbm_to_vmem [thread:$0]  %s149_s0, 128, %s17_s13, [#allocation3]  }
   0xc   :  { %110 = dma.done.wait [#allocation3], 128  }
   0xd   :  { %111 = vsyncadd [#allocation3], 4294967168  ;;  %v27_v0 = vld [vmem:[#allocation2] sm:$0xff]  ;;  %s115_s21 = smov [#allocation5]   ;;  %v116_v5 = vmov 0.0  }
   0xe   :  { %v64_v1 = vld [vmem:[%s150_s1] ss:$0 sm:$0xff]  ;;  %s55_s22 = sshll.u32 %s115_s21, 4  ;;  %s56_s22 = int_to_ptr.vmem [resolvable:$true] %s55_s22 }
   0xf   :  { %v65_v2 = vld [vmem:[%s151_s2] ss:$0 sm:$0xff]  ;;  %v35_v3 = vmul.f32 %v64_v1, %v27_v0  ;;  %s90_s0 = scalar_lea.vmem %s56_s22, 64  ;;  %p95_p6 = scmp.lt.s32.totalorder %s56_s22, %s56_s22 }
  0x10   :  { %p91_p5 = scmp.ne.s32.totalorder %s56_s22, %s90_s0  ;;  %p96_p7 = scmp.lt.s32.totalorder %s90_s0, %s90_s0 }
  0x11   :  { %v43_v4 = vsub.f32 %v35_v3, %v65_v2 }
  0x12   :  { %p97_p8 = por %p96_p7, %p95_p6 }
  0x13   :  { %vm44_vm0 = vcmp.gt.f32.partialorder %v43_v4, 0.0 }
  0x14   :  { %v66_v6 = vsel %vm44_vm0, 1.0, %v116_v5  ;;  %p98_p9 = pnand %p97_p8, %p91_p5 }
  0x15   :  { %v47_v7 = vpack.c.bf16 %v66_v6, %v66_v6 }
  0x17   :  { %48 = vst [vmem:[#allocation5] sm:$0xf] %v47_v7 }
  0x18   :  { %101 = shalt.err (!%p98_p9)
}
  0x19   :  { %58 = dma.vmem_to_hbm [thread:$0]  %s56_s22, 64, %s152_s3, [#allocation4]  }
  0x1a   :  { %112 = dma.done.wait [#allocation4], 64  }
  0x1b   :  { %113 = vsyncadd [#allocation4], 4294967232 }
  0x1c   :  { %62 = vsyncpa [#allocation3], 1 }
  0x1d   :  { %63 = vsyncpa [#allocation4], 1 }

</bundles_post_ra>
